<compile_context>
chip_gen: v7x
topology: tpu7x:2x2x1
jax: 0.10.0
libtpu: 0.0.40
codegen_flags: <defaults>
</compile_context>

<pallas_src>
import numpy as np

import jax
import jax.numpy as jnp
from jax.experimental import pallas as pl
from jax.experimental.pallas import tpu as pltpu


# ---------------------------------------------------------------------------
# Static layout of the packed weight slab (row_offset, fan_in, fan_out).
# All row offsets are multiples of 16 (bf16 sublane tile).
# ---------------------------------------------------------------------------
_ZDIM = 32
_IMG = 256            # 1 x 16 x 16, NCHW-flattened
_W_COLS = 256
_E1 = (0,   256, 256)   # conv1: (1,16,16) -> (4,8,8)
_E2 = (256, 256, 128)   # conv2: (4,8,8)   -> (8,4,4)
_E3 = (512, 128, 64)    # conv3: (8,4,4)   -> (16,2,2)
_ML = (640, 64, 64)     # fc1 || fc2 fused
_KD = (704, 64, 64)     # (fc3 . deconv1) folded, stacked x2 for [mu||eps*std]
_D2 = (768, 64, 128)    # deconv2: (16,2,2) -> (8,4,4)
_D3 = (832, 128, 256)   # deconv3: (8,4,4)  -> (4,8,8)
_W_ROWS = 960
_LAYERS = (_E1, _E2, _E3, _ML, _KD, _D2, _D3)


# ---------------------------------------------------------------------------
# Fused Pallas kernel: whole VAE forward, grid-less, fully VMEM-resident.
# ---------------------------------------------------------------------------
def _vae_fused_kernel(x_ref, eps_ref, w_ref, b_ref, out_ref):
    def mm(x, layer, brow):
        r0, k, n = layer
        w = w_ref[r0:r0 + k, :n]            # static slice of the packed slab
        b = b_ref[brow:brow + 1, :n]        # (1, n) bias row, f32
        return jnp.dot(x.astype(jnp.bfloat16), w,
                       preferred_element_type=jnp.float32) + b

    x = x_ref[...]                                      # (B, 256) NCHW-flat

    # --- encoder: three stride-2 convs folded into dense operators + ReLU ---
    h = jnp.maximum(mm(x, _E1, 0), 0.0)                 # (B, 256)  4x8x8
    h = jnp.maximum(mm(h, _E2, 1), 0.0)                 # (B, 128)  8x4x4
    h = jnp.maximum(mm(h, _E3, 2), 0.0)                 # (B, 64)   16x2x2

    # --- bottleneck: fc1 || fc2 fused into one matmul ------------------------
    ml = mm(h, _ML, 3)                                  # (B, 64) = mu || logvar

    # reparameterize without lane-extracting mu / logvar:
    # t = [mu || eps*std]; decoder weight is stacked so t @ KD2 == z @ KD.
    lane = jax.lax.broadcasted_iota(jnp.int32, (1, 2 * _ZDIM), 1)
    t = jnp.where(lane < _ZDIM, ml, eps_ref[...] * jnp.exp(0.5 * ml))

    # --- decoder: (fc3 . deconv1) folded, then deconv2, deconv3 --------------
    d = jnp.maximum(mm(t, _KD, 4), 0.0)                 # (B, 64)   16x2x2
    d = jnp.maximum(mm(d, _D2, 5), 0.0)                 # (B, 128)  8x4x4
    y = mm(d, _D3, 6)                                   # (B, 256)  4x8x8

    # numerically stable sigmoid: one exp + one approx reciprocal (both EUP)
    e = jnp.exp(-jnp.abs(y))
    r = pl.reciprocal(1.0 + e, approx=True)
    out_ref[:, :_IMG] = jnp.where(y >= 0.0, r, e * r)   # reconstruction
    out_ref[:, _IMG:] = ml                              # mu || logvar


def vae_forward(packed, x, eps):
    """Forward pass of VAE_PACS_ResNet. Returns (reconstruction, mu, logvar)."""
    w_slab, b_slab = packed
    xf = x.reshape(-1, _IMG).astype(jnp.float32)        # == torch .view(-1,1,16,16)
    B = xf.shape[0]
    # eps lands in lanes zdim..2*zdim-1 so the kernel never lane-shifts it
    ep = jnp.pad(eps.astype(jnp.float32), ((0, 0), (_ZDIM, 0)))

    vmem = pl.BlockSpec(memory_space=pltpu.MemorySpace.VMEM)
    out = pl.pallas_call(
        _vae_fused_kernel,
        out_shape=jax.ShapeDtypeStruct((B, _IMG + 2 * _ZDIM), jnp.float32),
        in_specs=[vmem, vmem, vmem, vmem],
        out_specs=vmem,
    )(xf, ep, w_slab, b_slab)

    recon = out[:, :_IMG].reshape(B, 1, 16, 16)         # exactly torch's .view
    mu = out[:, _IMG:_IMG + _ZDIM]
    logvar = out[:, _IMG + _ZDIM:]
    return recon, mu, logvar


# ---------------------------------------------------------------------------
# One-time host-side weight preprocessing (outside jit): fold each conv /
# transposed conv into a dense operator on NCHW-flattened features, fold fc3
# into deconv1, then pack everything into one bf16 weight slab + one f32 bias
# slab.  Zero per-forward cost.
# ---------------------------------------------------------------------------
def _conv2d_as_matrix(w, H, W, stride, pad):
    """Dense operator of Conv2d (PyTorch weight layout (Cout, Cin, kh, kw)).
    Row index = ci*H*W + ih*W + iw; column index = co*OH*OW + oh*OW + ow."""
    w = np.asarray(w, np.float32)
    Cout, Cin, KH, KW = w.shape
    OH = (H + 2 * pad - KH) // stride + 1
    OW = (W + 2 * pad - KW) // stride + 1
    M = np.zeros((Cin * H * W, Cout * OH * OW), np.float32)
    for co in range(Cout):
        for ci in range(Cin):
            for kh in range(KH):
                for kw in range(KW):
                    wv = w[co, ci, kh, kw]
                    for oh in range(OH):
                        ih = oh * stride + kh - pad
                        if ih < 0 or ih >= H:
                            continue
                        for ow in range(OW):
                            iw = ow * stride + kw - pad
                            if iw < 0 or iw >= W:
                                continue
                            M[ci * H * W + ih * W + iw,
                              co * OH * OW + oh * OW + ow] += wv
    return M


def _deconv2d_as_matrix(w, H, W, stride):
    """Dense operator of ConvTranspose2d (PyTorch weight layout (Cin, Cout, kh, kw)),
    padding=0.  Same flattening convention as _conv2d_as_matrix."""
    w = np.asarray(w, np.float32)
    Cin, Cout, KH, KW = w.shape
    OH = (H - 1) * stride + KH
    OW = (W - 1) * stride + KW
    M = np.zeros((Cin * H * W, Cout * OH * OW), np.float32)
    for ci in range(Cin):
        for co in range(Cout):
            for kh in range(KH):
                for kw in range(KW):
                    wv = w[ci, co, kh, kw]
                    for ih in range(H):
                        oh = ih * stride + kh
                        for iw in range(W):
                            ow = iw * stride + kw
                            M[ci * H * W + ih * W + iw,
                              co * OH * OW + oh * OW + ow] += wv
    return M


def preprocess_params(p):
    f = lambda a: np.asarray(a, np.float32)

    e1w = _conv2d_as_matrix(p["conv1_w"], 16, 16, 2, 1)             # (256, 256)
    e2w = _conv2d_as_matrix(p["conv2_w"], 8, 8, 2, 1)               # (256, 128)
    e3w = _conv2d_as_matrix(p["conv3_w"], 4, 4, 2, 1)               # (128, 64)
    mlw = np.concatenate([f(p["fc1_w"]).T, f(p["fc2_w"]).T], 1)     # (64, 64)
    f3w = f(p["fc3_w"]).T                                           # (32, 64)
    d1w = _deconv2d_as_matrix(p["deconv1_w"], 1, 1, 1)              # (64, 64), k=2,s=1 on 1x1
    d2w = _deconv2d_as_matrix(p["deconv2_w"], 2, 2, 2)              # (64, 128)
    d3w = _deconv2d_as_matrix(p["deconv3_w"], 4, 4, 2)              # (128, 256)

    # fold fc3 into deconv1 (no nonlinearity between them), stack x2 so the
    # kernel can feed [mu || eps*std] straight in.
    d1b = np.repeat(f(p["deconv1_b"]), 4)                           # 16 ch x 2x2
    kd = f3w @ d1w                                                  # (32, 64)
    kd2 = np.concatenate([kd, kd], 0)                               # (64, 64)
    kdb = f(p["fc3_b"]) @ d1w + d1b

    mats = [e1w, e2w, e3w, mlw, kd2, d2w, d3w]
    biases = [
        np.repeat(f(p["conv1_b"]), 64),                             # 4  ch x 8x8
        np.repeat(f(p["conv2_b"]), 16),                             # 8  ch x 4x4
        np.repeat(f(p["conv3_b"]), 4),                              # 16 ch x 2x2
        np.concatenate([f(p["fc1_b"]), f(p["fc2_b"])]),
        kdb,
        np.repeat(f(p["deconv2_b"]), 16),                           # 8  ch x 4x4
        np.repeat(f(p["deconv3_b"]), 64),                           # 4  ch x 8x8
    ]

    w_slab = np.zeros((_W_ROWS, _W_COLS), np.float32)
    b_slab = np.zeros((8, _W_COLS), np.float32)
    for i, ((r0, k, n), m, bv) in enumerate(zip(_LAYERS, mats, biases)):
        assert m.shape == (k, n) and bv.shape == (n,)
        w_slab[r0:r0 + k, :n] = m
        b_slab[i, :n] = bv
    return jnp.asarray(w_slab, jnp.bfloat16), jnp.asarray(b_slab, jnp.float32)


# ---------------------------------------------------------------------------
# Parameters (deterministic, PyTorch-default-like uniform init)
# ---------------------------------------------------------------------------
def init_params(key):
    def u(k, shape, fan_in):
        bound = 1.0 / np.sqrt(float(fan_in))
        return jax.random.uniform(k, shape, jnp.float32, -bound, bound)

    ks = jax.random.split(key, 18)
    p = {}
    p["conv1_w"], p["conv1_b"] = u(ks[0], (4, 1, 3, 3), 9), u(ks[1], (4,), 9)
    p["conv2_w"], p["conv2_b"] = u(ks[2], (8, 4, 3, 3), 36), u(ks[3], (8,), 36)
    p["conv3_w"], p["conv3_b"] = u(ks[4], (16, 8, 3, 3), 72), u(ks[5], (16,), 72)
    p["fc1_w"], p["fc1_b"] = u(ks[6], (32, 64), 64), u(ks[7], (32,), 64)
    p["fc2_w"], p["fc2_b"] = u(ks[8], (32, 64), 64), u(ks[9], (32,), 64)
    p["fc3_w"], p["fc3_b"] = u(ks[10], (64, 32), 32), u(ks[11], (64,), 32)
    p["deconv1_w"], p["deconv1_b"] = u(ks[12], (64, 16, 2, 2), 64), u(ks[13], (16,), 64)
    p["deconv2_w"], p["deconv2_b"] = u(ks[14], (16, 8, 2, 2), 32), u(ks[15], (8,), 32)
    p["deconv3_w"], p["deconv3_b"] = u(ks[16], (8, 4, 2, 2), 16), u(ks[17], (4,), 16)
    return p


# ---------------------------------------------------------------------------
# Pure-JAX reference of the PyTorch module (used only for the parity check)
# ---------------------------------------------------------------------------
def _ref_conv(x, w, b):
    y = jax.lax.conv_general_dilated(
        x, w, window_strides=(2, 2), padding=((1, 1), (1, 1)),
        dimension_numbers=("NCHW", "OIHW", "NCHW"))
    return y + b[None, :, None, None]


def _ref_deconv(x, w, b):
    # Valid for stride == k (non-overlapping) or a 1x1 input — both cases here.
    B, Cin, H, W = x.shape
    Cout, k = w.shape[1], w.shape[2]
    y = jnp.einsum("bihw,iokl->bohkwl", x, w).reshape(B, Cout, H * k, W * k)
    return y + b[None, :, None, None]


def reference_forward(p, x, eps):
    x = x.reshape(-1, 1, 16, 16).astype(jnp.float32)
    h = jax.nn.relu(_ref_conv(x, p["conv1_w"], p["conv1_b"]))
    h = jax.nn.relu(_ref_conv(h, p["conv2_w"], p["conv2_b"]))
    h = jax.nn.relu(_ref_conv(h, p["conv3_w"], p["conv3_b"]))
    hf = h.reshape(h.shape[0], -1)
    mu = hf @ p["fc1_w"].T + p["fc1_b"]
    lv = hf @ p["fc2_w"].T + p["fc2_b"]
    z = mu + eps * jnp.exp(0.5 * lv)
    d = (z @ p["fc3_w"].T + p["fc3_b"]).reshape(-1, 64, 1, 1)
    d = jax.nn.relu(_ref_deconv(d, p["deconv1_w"], p["deconv1_b"]))
    d = jax.nn.relu(_ref_deconv(d, p["deconv2_w"], p["deconv2_b"]))
    d = jax.nn.sigmoid(_ref_deconv(d, p["deconv3_w"], p["deconv3_b"]))
    return d.reshape(-1, 1, 16, 16), mu, lv


if __name__ == "__main__":
    key = jax.random.PRNGKey(0)
    pkey, xkey, ekey = jax.random.split(key, 3)

    params = init_params(pkey)
    packed = preprocess_params(params)      # one-time host-side folding/packing

    x = jax.random.uniform(xkey, (2, 1, 16, 16), jnp.float32)
    # eps for reparameterization (torch.randn_like) supplied deterministically
    eps = jax.random.normal(ekey, (2, _ZDIM), jnp.float32)

    fwd = jax.jit(vae_forward)
    out, mu, logvar = fwd(packed, x, eps)
    jax.block_until_ready((out, mu, logvar))

    assert out.shape == (2, 1, 16, 16)
    assert mu.shape == (2, _ZDIM) and logvar.shape == (2, _ZDIM)
    assert bool(jnp.all(jnp.isfinite(out)))
    assert bool(jnp.all((out >= -1e-5) & (out <= 1.0 + 1e-5)))

    # structural parity vs. a pure-JAX reference (tolerance covers bf16 weights
    # + MXU accumulation, still catches any layout / folding / packing bug)
    with jax.default_matmul_precision("highest"):
        r_out, r_mu, r_lv = reference_forward(params, x, eps)
    np.testing.assert_allclose(np.asarray(mu), np.asarray(r_mu), rtol=5e-2, atol=5e-2)
    np.testing.assert_allclose(np.asarray(logvar), np.asarray(r_lv), rtol=5e-2, atol=5e-2)
    np.testing.assert_allclose(np.asarray(out), np.asarray(r_out), rtol=5e-2, atol=5e-2)

    print("KERNEL_OK")
</pallas_src>

<mosaic_0001>
module attributes {stable_mosaic.version = 11 : i64} {
  func.func @_vae_fused_kernel(%arg0: memref<2x256xf32, #tpu.memory_space<vmem>>, %arg1: memref<2x64xf32, #tpu.memory_space<vmem>>, %arg2: memref<960x256xbf16, #tpu.memory_space<vmem>>, %arg3: memref<8x256xf32, #tpu.memory_space<vmem>>, %arg4: memref<2x320xf32, #tpu.memory_space<vmem>>) attributes {dimension_semantics = [], scalar_prefetch = 0 : i64, scratch_operands = 0 : i64, tpu.core_type = #tpu.core_type<tc>} {
    %c0 = arith.constant 0 : index
    %c0_0 = arith.constant 0 : index
    %0 = vector.load %arg0[%c0, %c0_0] : memref<2x256xf32, #tpu.memory_space<vmem>>, vector<2x256xf32>
    %c0_1 = arith.constant 0 : index
    %c0_2 = arith.constant 0 : index
    %1 = vector.load %arg2[%c0_1, %c0_2] : memref<960x256xbf16, #tpu.memory_space<vmem>>, vector<256x256xbf16>
    %c0_3 = arith.constant 0 : index
    %c0_4 = arith.constant 0 : index
    %2 = vector.load %arg3[%c0_3, %c0_4] : memref<8x256xf32, #tpu.memory_space<vmem>>, vector<1x256xf32>
    %3 = arith.truncf %0 : vector<2x256xf32> to vector<2x256xbf16>
    %cst = arith.constant dense<0.000000e+00> : vector<2x256xf32>
    %4 = tpu.matmul %3, %1, %cst {dimension_numbers = #tpu.dot_dimension_numbers<[1], [0], [0], [1], [0, 0, 1, 1], [], []>} : vector<2x256xbf16>, vector<256x256xbf16>, vector<2x256xf32> -> vector<2x256xf32>
    %5 = vector.broadcast %2 : vector<1x256xf32> to vector<2x256xf32>
    %6 = arith.addf %4, %5 : vector<2x256xf32>
    %cst_5 = arith.constant 0.000000e+00 : f32
    %7 = vector.broadcast %cst_5 : f32 to vector<2x256xf32>
    %8 = arith.maximumf %6, %7 : vector<2x256xf32>
    %c256 = arith.constant 256 : index
    %c0_6 = arith.constant 0 : index
    %9 = vector.load %arg2[%c256, %c0_6] : memref<960x256xbf16, #tpu.memory_space<vmem>>, vector<256x128xbf16>
    %c1 = arith.constant 1 : index
    %c0_7 = arith.constant 0 : index
    %10 = vector.load %arg3[%c1, %c0_7] : memref<8x256xf32, #tpu.memory_space<vmem>>, vector<1x128xf32>
    %11 = arith.truncf %8 : vector<2x256xf32> to vector<2x256xbf16>
    %cst_8 = arith.constant dense<0.000000e+00> : vector<2x128xf32>
    %12 = tpu.matmul %11, %9, %cst_8 {dimension_numbers = #tpu.dot_dimension_numbers<[1], [0], [0], [1], [0, 0, 1, 1], [], []>} : vector<2x256xbf16>, vector<256x128xbf16>, vector<2x128xf32> -> vector<2x128xf32>
    %13 = vector.broadcast %10 : vector<1x128xf32> to vector<2x128xf32>
    %14 = arith.addf %12, %13 : vector<2x128xf32>
    %cst_9 = arith.constant 0.000000e+00 : f32
    %15 = vector.broadcast %cst_9 : f32 to vector<2x128xf32>
    %16 = arith.maximumf %14, %15 : vector<2x128xf32>
    %c512 = arith.constant 512 : index
    %c0_10 = arith.constant 0 : index
    %17 = vector.load %arg2[%c512, %c0_10] : memref<960x256xbf16, #tpu.memory_space<vmem>>, vector<128x64xbf16>
    %c2 = arith.constant 2 : index
    %c0_11 = arith.constant 0 : index
    %18 = vector.load %arg3[%c2, %c0_11] : memref<8x256xf32, #tpu.memory_space<vmem>>, vector<1x64xf32>
    %19 = arith.truncf %16 : vector<2x128xf32> to vector<2x128xbf16>
    %cst_12 = arith.constant dense<0.000000e+00> : vector<2x64xf32>
    %20 = tpu.matmul %19, %17, %cst_12 {dimension_numbers = #tpu.dot_dimension_numbers<[1], [0], [0], [1], [0, 0, 1, 1], [], []>} : vector<2x128xbf16>, vector<128x64xbf16>, vector<2x64xf32> -> vector<2x64xf32>
    %21 = vector.broadcast %18 : vector<1x64xf32> to vector<2x64xf32>
    %22 = arith.addf %20, %21 : vector<2x64xf32>
    %cst_13 = arith.constant 0.000000e+00 : f32
    %23 = vector.broadcast %cst_13 : f32 to vector<2x64xf32>
    %24 = arith.maximumf %22, %23 : vector<2x64xf32>
    %c640 = arith.constant 640 : index
    %c0_14 = arith.constant 0 : index
    %25 = vector.load %arg2[%c640, %c0_14] : memref<960x256xbf16, #tpu.memory_space<vmem>>, vector<64x64xbf16>
    %c3 = arith.constant 3 : index
    %c0_15 = arith.constant 0 : index
    %26 = vector.load %arg3[%c3, %c0_15] : memref<8x256xf32, #tpu.memory_space<vmem>>, vector<1x64xf32>
    %27 = arith.truncf %24 : vector<2x64xf32> to vector<2x64xbf16>
    %cst_16 = arith.constant dense<0.000000e+00> : vector<2x64xf32>
    %28 = tpu.matmul %27, %25, %cst_16 {dimension_numbers = #tpu.dot_dimension_numbers<[1], [0], [0], [1], [0, 0, 1, 1], [], []>} : vector<2x64xbf16>, vector<64x64xbf16>, vector<2x64xf32> -> vector<2x64xf32>
    %29 = vector.broadcast %26 : vector<1x64xf32> to vector<2x64xf32>
    %30 = arith.addf %28, %29 : vector<2x64xf32>
    %31 = tpu.iota {dimensions = array<i32: 1>} : vector<1x64xi32>
    %c32_i32 = arith.constant 32 : i32
    %32 = vector.broadcast %c32_i32 : i32 to vector<1x64xi32>
    %33 = arith.cmpi slt, %31, %32 : vector<1x64xi32>
    %c0_17 = arith.constant 0 : index
    %c0_18 = arith.constant 0 : index
    %34 = vector.load %arg1[%c0_17, %c0_18] : memref<2x64xf32, #tpu.memory_space<vmem>>, vector<2x64xf32>
    %cst_19 = arith.constant 5.000000e-01 : f32
    %35 = vector.broadcast %cst_19 : f32 to vector<2x64xf32>
    %36 = arith.mulf %35, %30 : vector<2x64xf32>
    %37 = math.exp %36 : vector<2x64xf32>
    %38 = arith.mulf %34, %37 : vector<2x64xf32>
    %39 = vector.shape_cast %33 : vector<1x64xi1> to vector<1x64xi1>
    %40 = vector.broadcast %39 : vector<1x64xi1> to vector<2x64xi1>
    %41 = arith.select %40, %30, %38 : vector<2x64xi1>, vector<2x64xf32>
    %c704 = arith.constant 704 : index
    %c0_20 = arith.constant 0 : index
    %42 = vector.load %arg2[%c704, %c0_20] : memref<960x256xbf16, #tpu.memory_space<vmem>>, vector<64x64xbf16>
    %c4 = arith.constant 4 : index
    %c0_21 = arith.constant 0 : index
    %43 = vector.load %arg3[%c4, %c0_21] : memref<8x256xf32, #tpu.memory_space<vmem>>, vector<1x64xf32>
    %44 = arith.truncf %41 : vector<2x64xf32> to vector<2x64xbf16>
    %cst_22 = arith.constant dense<0.000000e+00> : vector<2x64xf32>
    %45 = tpu.matmul %44, %42, %cst_22 {dimension_numbers = #tpu.dot_dimension_numbers<[1], [0], [0], [1], [0, 0, 1, 1], [], []>} : vector<2x64xbf16>, vector<64x64xbf16>, vector<2x64xf32> -> vector<2x64xf32>
    %46 = vector.broadcast %43 : vector<1x64xf32> to vector<2x64xf32>
    %47 = arith.addf %45, %46 : vector<2x64xf32>
    %cst_23 = arith.constant 0.000000e+00 : f32
    %48 = vector.broadcast %cst_23 : f32 to vector<2x64xf32>
    %49 = arith.maximumf %47, %48 : vector<2x64xf32>
    %c768 = arith.constant 768 : index
    %c0_24 = arith.constant 0 : index
    %50 = vector.load %arg2[%c768, %c0_24] : memref<960x256xbf16, #tpu.memory_space<vmem>>, vector<64x128xbf16>
    %c5 = arith.constant 5 : index
    %c0_25 = arith.constant 0 : index
    %51 = vector.load %arg3[%c5, %c0_25] : memref<8x256xf32, #tpu.memory_space<vmem>>, vector<1x128xf32>
    %52 = arith.truncf %49 : vector<2x64xf32> to vector<2x64xbf16>
    %cst_26 = arith.constant dense<0.000000e+00> : vector<2x128xf32>
    %53 = tpu.matmul %52, %50, %cst_26 {dimension_numbers = #tpu.dot_dimension_numbers<[1], [0], [0], [1], [0, 0, 1, 1], [], []>} : vector<2x64xbf16>, vector<64x128xbf16>, vector<2x128xf32> -> vector<2x128xf32>
    %54 = vector.broadcast %51 : vector<1x128xf32> to vector<2x128xf32>
    %55 = arith.addf %53, %54 : vector<2x128xf32>
    %cst_27 = arith.constant 0.000000e+00 : f32
    %56 = vector.broadcast %cst_27 : f32 to vector<2x128xf32>
    %57 = arith.maximumf %55, %56 : vector<2x128xf32>
    %c832 = arith.constant 832 : index
    %c0_28 = arith.constant 0 : index
    %58 = vector.load %arg2[%c832, %c0_28] : memref<960x256xbf16, #tpu.memory_space<vmem>>, vector<128x256xbf16>
    %c6 = arith.constant 6 : index
    %c0_29 = arith.constant 0 : index
    %59 = vector.load %arg3[%c6, %c0_29] : memref<8x256xf32, #tpu.memory_space<vmem>>, vector<1x256xf32>
    %60 = arith.truncf %57 : vector<2x128xf32> to vector<2x128xbf16>
    %cst_30 = arith.constant dense<0.000000e+00> : vector<2x256xf32>
    %61 = tpu.matmul %60, %58, %cst_30 {dimension_numbers = #tpu.dot_dimension_numbers<[1], [0], [0], [1], [0, 0, 1, 1], [], []>} : vector<2x128xbf16>, vector<128x256xbf16>, vector<2x256xf32> -> vector<2x256xf32>
    %62 = vector.broadcast %59 : vector<1x256xf32> to vector<2x256xf32>
    %63 = arith.addf %61, %62 : vector<2x256xf32>
    %64 = math.absf %63 : vector<2x256xf32>
    %cst_31 = arith.constant 0.000000e+00 : f32
    %65 = vector.broadcast %cst_31 : f32 to vector<2x256xf32>
    %66 = arith.subf %65, %64 : vector<2x256xf32>
    %67 = math.exp %66 : vector<2x256xf32>
    %cst_32 = arith.constant 1.000000e+00 : f32
    %68 = vector.broadcast %cst_32 : f32 to vector<2x256xf32>
    %69 = arith.addf %68, %67 : vector<2x256xf32>
    %70 = tpu.reciprocal %69 {approx = true} : vector<2x256xf32> -> vector<2x256xf32>
    %cst_33 = arith.constant 0.000000e+00 : f32
    %71 = vector.broadcast %cst_33 : f32 to vector<2x256xf32>
    %72 = arith.cmpf oge, %63, %71 : vector<2x256xf32>
    %73 = arith.mulf %67, %70 : vector<2x256xf32>
    %74 = arith.select %72, %70, %73 : vector<2x256xi1>, vector<2x256xf32>
    %c0_34 = arith.constant 0 : index
    %c0_35 = arith.constant 0 : index
    %75 = vector.load %arg4[%c0_34, %c0_35] : memref<2x320xf32, #tpu.memory_space<vmem>>, vector<2x256xf32>
    tpu.vector_store %arg4[%c0_34, %c0_35], %74 {strides = array<i32>} : memref<2x320xf32, #tpu.memory_space<vmem>>, vector<2x256xf32>,
    %c0_36 = arith.constant 0 : index
    %c256_37 = arith.constant 256 : index
    %76 = vector.load %arg4[%c0_36, %c256_37] : memref<2x320xf32, #tpu.memory_space<vmem>>, vector<2x64xf32>
    tpu.vector_store %arg4[%c0_36, %c256_37], %30 {strides = array<i32>} : memref<2x320xf32, #tpu.memory_space<vmem>>, vector<2x64xf32>,
    return
  }
}

</mosaic_0001>

<bundles_post_ra>
// kernel: vae_forward.1
= control target key start
LH: loop header
LB: loop body
LE: loop exit
PB: predicated region body
PF: predicated region fallthrough
CT: control target
= control target key end

     0   :  { %9 = vsyncpa [#allocation3], 0  ;;  %s1345_s15 = smov [#allocation2]   ;;  %s1472_s0 = inlined_call_operand.vmem [shape: f32[2,256], index: 0, kind: input, shape index: {}]   ;;  %s1473_s1 = inlined_call_operand.vmem [shape: f32[2,64], index: 1, kind: input, shape index: {}]   ;;  %s1474_s2 = inlined_call_operand.hbm [shape: bf16[960,256], index: 2, kind: input, shape index: {}]   ;;  %s1475_s3 = inlined_call_operand.vmem [shape: f32[8,256], index: 3, kind: input, shape index: {}]   ;;  %s1476_s4 = inlined_call_operand.vmem [shape: f32[2,320], index: 4, kind: output, shape index: {}]  }
   0x1   :  { %s19_s16 = sshll.u32 %s1345_s15, 4  ;;  %s1321_s19 = scalar_lea.hbm %s1474_s2, 15360  ;;  %s20_s16 = int_to_ptr.vmem [resolvable:$true] %s19_s16 }
   0x2   :  { %p1322_p0 = scmp.ne.s32.totalorder %s1474_s2, %s1321_s19  ;;  %p1325_p1 = scmp.lt.u32.totalorder %s1321_s19, %s1474_s2 }
   0x4   :  { %p1327_p2 = pnand %p1325_p1, %p1322_p0 }
   0x6   :  { %1330 = shalt.err (!%p1327_p2)
}
   0x7   :  { %s1331_s24 = scalar_lea.vmem %s20_s16, 15360  ;;  %p1336_p4 = scmp.lt.s32.totalorder %s20_s16, %s20_s16 }
   0x8   :  { %p1332_p3 = scmp.ne.s32.totalorder %s20_s16, %s1331_s24  ;;  %p1337_p5 = scmp.lt.s32.totalorder %s1331_s24, %s1331_s24 }
   0xa   :  { %p1338_p6 = por %p1337_p5, %p1336_p4 }
   0xc   :  { %p1339_p7 = pnand %p1338_p6, %p1332_p3 }
   0xe   :  { %1342 = shalt.err (!%p1339_p7)
}
   0xf   :  { %s1346_s25 = smov 128   ;;  %s1347_s26 = smov 8  }
  0x10   :  { %25 = dma.hbm_to_vmem [thread:$0]  %s1474_s2, 15360, %s20_s16, [#allocation3], %s1346_s25, %s1346_s25, %s1347_s26  }
  0x11   :  { %1343 = dma.done.wait [#allocation3], 15360  }
  0x12   :  { %1344 = vsyncadd [#allocation3], 4294951936  ;;  %v1203_v0 = vld [vmem:[#allocation2 + $0x4] ss:$8 sps:$4 sm:$0xff]   ;;  %v1205_v1 = vld [vmem:[#allocation2] ss:$8 sps:$4 sm:$0xff]   ;;  %v80_v53 = vlaneseq }
  0x13   :  { %250 = vmatprep.subr.bf16.mxu0 %v1203_v0  ;;  %v1206_v2 = vld [vmem:[#allocation2 + $0x14] ss:$8 sps:$4 sm:$0xff]   ;;  %v1208_v3 = vld [vmem:[#allocation2 + $0x10] ss:$8 sps:$4 sm:$0xff]   ;;  %v1209_v4 = vld [vmem:[#allocation2 + $0x24] ss:$8 sps:$4 sm:$0xff]  }
  0x14   :  { %251 = vmatpush1.bf16.msra.mxu0 %v1205_v1  ;;  %v1211_v5 = vld [vmem:[#allocation2 + $0x20] ss:$8 sps:$4 sm:$0xff]   ;;  %v1212_v6 = vld [vmem:[#allocation2 + $0x34] ss:$8 sps:$4 sm:$0xff]   ;;  %v1214_v7 = vld [vmem:[#allocation2 + $0x30] ss:$8 sps:$4 sm:$0xff]  }
  0x15   :  { %252 = vmatprep.subr.bf16.mxu0 %v1206_v2  ;;  %v1215_v8 = vld [vmem:[#allocation2 + $0x44] ss:$8 sps:$4 sm:$0xff]   ;;  %v1217_v9 = vld [vmem:[#allocation2 + $0x40] ss:$8 sps:$4 sm:$0xff]   ;;  %v1218_v10 = vld [vmem:[#allocation2 + $0x54] ss:$8 sps:$4 sm:$0xff]  }
  0x16   :  { %v1220_v11 = vld [vmem:[#allocation2 + $0x50] ss:$8 sps:$4 sm:$0xff]   ;;  %v1221_v12 = vld [vmem:[#allocation2 + $0x64] ss:$8 sps:$4 sm:$0xff]   ;;  %v1223_v13 = vld [vmem:[#allocation2 + $0x60] ss:$8 sps:$4 sm:$0xff]  }
  0x17   :  { %v1391_v14 = vld.sshfl [vmem:[%s1472_s0] sm:$0x33 pattern:$0x76325410]  ;;  %v1224_v15 = vld [vmem:[#allocation2 + $0x74] ss:$8 sps:$4 sm:$0xff]  }
  0x18   :  { %253 = vmatpush1.bf16.msra.mxu0 %v1208_v3  ;;  %v74_v16 = vcombine.high %v1391_v14, %v1391_v14  ;;  %v1251_v17 = vld [vmem:[#allocation2 + $0x180] ss:$8 sps:$4 sm:$0xff]   ;;  %v1253_v20 = vld [vmem:[#allocation2 + $0x190] ss:$8 sps:$4 sm:$0xff]   ;;  %v1227_v24 = vld [vmem:[#allocation2 + $0x84] ss:$8 sps:$4 sm:$0xff]   ;;  %v77_v47 = vpack.c.bf16 %v1391_v14, %v1391_v14 }
  0x19   :  { %254 = vmatprep.subr.bf16.mxu0 %v1209_v4  ;;  %v1252_v18 = vld [vmem:[#allocation2 + $0x100] ss:$8 sps:$4 sm:$0xff]   ;;  %1095 = vmatprep.subr.bf16.mxu1 %v1251_v17  ;;  %v1254_v21 = vld [vmem:[#allocation2 + $0x110] ss:$8 sps:$4 sm:$0xff]   ;;  %v1230_v28 = vld [vmem:[#allocation2 + $0x94] ss:$8 sps:$4 sm:$0xff]  }
  0x1a   :  { %v78_v19 = vpack.c.bf16 %v74_v16, %v74_v16  ;;  %1096 = vmatpush3.bf16.msra.mxu1 %v1252_v18  ;;  %v1255_v22 = vld [vmem:[#allocation2 + $0x1a0] ss:$8 sps:$4 sm:$0xff]   ;;  %v1226_v23 = vld [vmem:[#allocation2 + $0x70] ss:$8 sps:$4 sm:$0xff]   ;;  %v1233_v31 = vld [vmem:[#allocation2 + $0xa4] ss:$8 sps:$4 sm:$0xff]  }
  0x1b   :  { %1097 = vmatprep.subr.bf16.mxu1 %v1253_v20  ;;  %v1256_v25 = vld [vmem:[#allocation2 + $0x120] ss:$8 sps:$4 sm:$0xff]   ;;  %v1257_v26 = vld [vmem:[#allocation2 + $0x1b0] ss:$8 sps:$4 sm:$0xff]   ;;  %v1236_v36 = vld [vmem:[#allocation2 + $0xb4] ss:$8 sps:$4 sm:$0xff]  }
  0x1c   :  { %255 = vmatpush1.bf16.msra.mxu0 %v1211_v5  ;;  %282 = vmatprep.mubr.bf16.mxu0 %v78_v19  ;;  %v1229_v27 = vld [vmem:[#allocation2 + $0x80] ss:$8 sps:$4 sm:$0xff]   ;;  %v1232_v29 = vld [vmem:[#allocation2 + $0x90] ss:$8 sps:$4 sm:$0xff]   ;;  %v1239_v39 = vld [vmem:[#allocation2 + $0xc4] ss:$8 sps:$4 sm:$0xff]  }
  0x1d   :  { %256 = vmatprep.subr.bf16.mxu0 %v1212_v6  ;;  %v1258_v30 = vld [vmem:[#allocation2 + $0x130] ss:$8 sps:$4 sm:$0xff]   ;;  %v1259_v32 = vld [vmem:[#allocation2 + $0x1c0] ss:$8 sps:$4 sm:$0xff]   ;;  %v1242_v41 = vld [vmem:[#allocation2 + $0xd4] ss:$8 sps:$4 sm:$0xff]  }
  0x1e   :  { %1098 = vmatpush3.bf16.msra.mxu1 %v1254_v21  ;;  %v1260_v33 = vld [vmem:[#allocation2 + $0x140] ss:$8 sps:$4 sm:$0xff]   ;;  %v1261_v34 = vld [vmem:[#allocation2 + $0x1d0] ss:$8 sps:$4 sm:$0xff]   ;;  %v1245_v43 = vld [vmem:[#allocation2 + $0xe4] ss:$8 sps:$4 sm:$0xff]  }
  0x1f   :  { %1099 = vmatprep.subr.bf16.mxu1 %v1255_v22  ;;  %v1235_v35 = vld [vmem:[#allocation2 + $0xa0] ss:$8 sps:$4 sm:$0xff]   ;;  %v1262_v37 = vld [vmem:[#allocation2 + $0x150] ss:$8 sps:$4 sm:$0xff]   ;;  %v1248_v45 = vld [vmem:[#allocation2 + $0xf4] ss:$8 sps:$4 sm:$0xff]  }
  0x20   :  { %257 = vmatpush1.bf16.msra.mxu0 %v1214_v7  ;;  %v1238_v38 = vld [vmem:[#allocation2 + $0xb0] ss:$8 sps:$4 sm:$0xff]   ;;  %v1241_v40 = vld [vmem:[#allocation2 + $0xc0] ss:$8 sps:$4 sm:$0xff]   ;;  %v1348_v52 = vmov 0.0   ;;  %v1400_v54 = vshrl.u32 %v80_v53, 7 }
  0x21   :  { %258 = vmatprep.subr.bf16.mxu0 %v1215_v8  ;;  %v1244_v42 = vld [vmem:[#allocation2 + $0xd0] ss:$8 sps:$4 sm:$0xff]   ;;  %v1247_v44 = vld [vmem:[#allocation2 + $0xe0] ss:$8 sps:$4 sm:$0xff]   ;;  %vm1349_vm0 = vmmov 0   ;;  %vm606_vm1 = vcmask 523264  }
  0x22   :  { %1100 = vmatpush3.bf16.msra.mxu1 %v1256_v25  ;;  %v1250_v46 = vld [vmem:[#allocation2 + $0xf0] ss:$8 sps:$4 sm:$0xff]   ;;  %v1263_v48 = vld [vmem:[#allocation2 + $0x1e0] ss:$8 sps:$4 sm:$0xff]   ;;  %v82_v55 = vsub.s32 0, %v1400_v54  ;;  %v86_v57 = vsub.s32 1, %v1400_v54 }
  0x23   :  { %1101 = vmatprep.subr.bf16.mxu1 %v1257_v26  ;;  %v1264_v49 = vld [vmem:[#allocation2 + $0x160] ss:$8 sps:$4 sm:$0xff]   ;;  %v1265_v50 = vld [vmem:[#allocation2 + $0x1f0] ss:$8 sps:$4 sm:$0xff]   ;;  %vm998_vm2 = vcmask 517120  }
  0x24   :  { %259 = vmatpush1.bf16.msra.mxu0 %v1217_v9  ;;  %v1266_v51 = vld [vmem:[#allocation2 + $0x170] ss:$8 sps:$4 sm:$0xff]   ;;  %v65_v56 = vld [vmem:[%s1475_s3] ss:$8 sm:$0x3] }
  0x25   :  { %260 = vmatprep.subr.bf16.mxu0 %v1218_v10  ;;  %v83_v58 = vrot.slane %v65_v56, %v82_v55  ;;  %v87_v59 = vrot.slane %v65_v56, %v86_v57  ;;  %v1267_v5 = vld [vmem:[#allocation2 + $0x200] ss:$8 sps:$4 sm:$0xff]   ;;  %v1268_v7 = vld [vmem:[#allocation2 + $0x210] ss:$8 sps:$4 sm:$0xff]  }
  0x26   :  { %1102 = vmatpush3.bf16.msra.mxu1 %v1258_v30  ;;  %v1269_v8 = vld [vmem:[#allocation2 + $0x220] ss:$8 sps:$4 sm:$0xff]   ;;  %v1270_v9 = vld [vmem:[#allocation2 + $0x230] ss:$8 sps:$4 sm:$0xff]  }
  0x27   :  { %1103 = vmatprep.subr.bf16.mxu1 %v1259_v32  ;;  %v1271_v10 = vld [vmem:[#allocation2 + $0x240] ss:$8 sps:$4 sm:$0xff]   ;;  %v1278_v26 = vld [vmem:[#allocation2 + $0x2b0] ss:$8 sps:$4 sm:$0xff]  }
  0x28   :  { %261 = vmatpush1.bf16.msra.mxu0 %v1220_v11  ;;  %v1272_v11 = vld [vmem:[#allocation2 + $0x250] ss:$8 sps:$4 sm:$0xff]   ;;  %v1275_v14 = vld [vmem:[#allocation2 + $0x280] ss:$8 sps:$4 sm:$0xff]  }
  0x29   :  { %262 = vmatprep.subr.bf16.mxu0 %v1221_v12  ;;  %v1273_v12 = vld [vmem:[#allocation2 + $0x260] ss:$8 sps:$4 sm:$0xff]  }
  0x2a   :  { %1104 = vmatpush3.bf16.msra.mxu1 %v1260_v33  ;;  %v325_v17 = vld [vmem:[%s1475_s3 + $0x1] ss:$0 sm:$0xff] }
  0x2b   :  { %1105 = vmatprep.subr.bf16.mxu1 %v1261_v34  ;;  %v1277_v25 = vld [vmem:[#allocation2 + $0x2a0] ss:$8 sps:$4 sm:$0xff]  }
  0x2c   :  { %263 = vmatpush1.bf16.msra.mxu0 %v1223_v13  ;;  %v1274_v13 = vld [vmem:[#allocation2 + $0x270] ss:$8 sps:$4 sm:$0xff]  }
  0x2d   :  { %264 = vmatprep.subr.bf16.mxu0 %v1224_v15  ;;  %v1276_v15 = vld [vmem:[#allocation2 + $0x290] ss:$8 sps:$4 sm:$0xff]  }
  0x2e   :  { %1106 = vmatpush3.bf16.msra.mxu1 %v1262_v37  ;;  %v1281_v37 = vld [vmem:[#allocation2 + $0x2e0] ss:$8 sps:$4 sm:$0xff]  }
  0x2f   :  { %1107 = vmatprep.subr.bf16.mxu1 %v1263_v48 }
  0x30   :  { %265 = vmatpush1.bf16.msra.mxu0 %v1226_v23 }
  0x31   :  { %266 = vmatprep.subr.bf16.mxu0 %v1227_v24 }
  0x32   :  { %1108 = vmatpush3.bf16.msra.mxu1 %v1264_v49  ;;  %v651_v49 = vand.u32 127, %v80_v53  ;;  %v1292_v53 = vld [vmem:[#allocation2 + $0x354] ss:$8 sps:$4 sm:$0xff]  }
  0x33   :  { %1109 = vmatprep.subr.bf16.mxu1 %v1265_v50  ;;  %v653_v50 = vld [vmem:[%s1473_s1] sm:$0x3] }
  0x34   :  { %267 = vmatpush1.bf16.msra.mxu0 %v1229_v27  ;;  %v481_v27 = vld [vmem:[%s1475_s3 + $0x2] ss:$0 sm:$0xff]  ;;  %vm652_vm3 = vcmp.lt.s32.totalorder %v651_v49, 32 }
  0x35   :  { %268 = vmatprep.subr.bf16.mxu0 %v1230_v28 }
  0x36   :  { %1110 = vmatpush3.bf16.msra.mxu1 %v1266_v51 }
  0x37   :  { %1141 = vmatprep.subr.bf16.mxu1 %v1348_v52 }
  0x38   :  { %269 = vmatpush1.bf16.msra.mxu0 %v1232_v29 }
  0x39   :  { %270 = vmatprep.subr.bf16.mxu0 %v1233_v31 }
  0x3c   :  { %271 = vmatpush1.bf16.msra.mxu0 %v1235_v35  ;;  %v1279_v35 = vld [vmem:[#allocation2 + $0x2c0] ss:$8 sps:$4 sm:$0xff]  }
  0x3d   :  { %272 = vmatprep.subr.bf16.mxu0 %v1236_v36  ;;  %v1280_v36 = vld [vmem:[#allocation2 + $0x2d0] ss:$8 sps:$4 sm:$0xff]  }
  0x40   :  { %273 = vmatpush1.bf16.msra.mxu0 %v1238_v38  ;;  %v1282_v38 = vld [vmem:[#allocation2 + $0x2f0] ss:$8 sps:$4 sm:$0xff]  }
  0x41   :  { %274 = vmatprep.subr.bf16.mxu0 %v1239_v39  ;;  %v1283_v39 = vld [vmem:[#allocation2 + $0x300] ss:$8 sps:$4 sm:$0xff]  }
  0x44   :  { %275 = vmatpush1.bf16.msra.mxu0 %v1241_v40  ;;  %v1284_v40 = vld [vmem:[#allocation2 + $0x310] ss:$8 sps:$4 sm:$0xff]  }
  0x45   :  { %276 = vmatprep.subr.bf16.mxu0 %v1242_v41  ;;  %v580_v41 = vld [vmem:[%s1475_s3 + $0x3] ss:$0 sm:$0xff] }
  0x48   :  { %277 = vmatpush1.bf16.msra.mxu0 %v1244_v42 }
  0x49   :  { %278 = vmatprep.subr.bf16.mxu0 %v1245_v43 }
  0x4c   :  { %279 = vmatpush1.bf16.msra.mxu0 %v1247_v44 }
  0x4d   :  { %280 = vmatprep.subr.bf16.mxu0 %v1248_v45 }
  0x50   :  { %281 = vmatpush1.bf16.msra.mxu0 %v1250_v46 }
  0x51   :  { %1161 = vmatprep.subr.bf16.mxu0 %v1348_v52 }
  0x53   :  { %283 = vmatmul.mubr.bf16.vlgmr.msra.gmra.mrb[0].mxu0 %v77_v47 }
  0x54   :  { %1169 = vmatprep.mubr.msk.bf16.mxu0 %vm1349_vm0, %v1348_v52  ;;  %1162 = vmatpush3.bf16.msra.mxu0 %v1275_v14 }
  0x55   :  { %1163 = vmatprep.subr.bf16.mxu0 %v1348_v52 }
  0x58   :  { %1164 = vmatpush3.bf16.msra.mxu0 %v1276_v15 }
  0x59   :  { %1165 = vmatprep.subr.bf16.mxu0 %v1348_v52 }
  0x5c   :  { %1166 = vmatpush3.bf16.msra.mxu0 %v1277_v25 }
  0x5d   :  { %1167 = vmatprep.subr.bf16.mxu0 %v1348_v52 }
  0x60   :  { %1168 = vmatpush3.bf16.msra.mxu0 %v1278_v26 }
  0x61   :  { %1185 = vmatprep.subr.bf16.mxu0 %v1348_v52 }
 0x126   :  { %v284_v60 = vpop.f32.mrb[0].mxu0 }
 0x127   :  { %v285_v61 = vadd.f32 %v284_v60, %v83_v58  ;;  %v286_v62 = vpop.f32.mrb[1].mxu0  ;;  %v1285_v60 = vld [vmem:[#allocation2 + $0x320] ss:$8 sps:$4 sm:$0xff]  }
 0x128   :  { %v287_v63 = vadd.f32 %v286_v62, %v87_v59  ;;  %v288_v0 = vpop.f32.mrb[2].mxu0  ;;  %v1287_v62 = vld [vmem:[#allocation2 + $0x340] ss:$8 sps:$4 sm:$0xff]  }
 0x129   :  { %v291_v1 = vmax.f32 %v285_v61, 0.0  ;;  %v289_v2 = vpop.f32.mrb[3].mxu0  ;;  %v1286_v61 = vld [vmem:[#allocation2 + $0x330] ss:$8 sps:$4 sm:$0xff]  }
 0x12a   :  { %v292_v3 = vmax.f32 %v287_v63, 0.0  ;;  %v1289_v63 = vld [vmem:[#allocation2 + $0x344] ss:$8 sps:$4 sm:$0xff]   ;;  %v1290_v0 = vld [vmem:[#allocation2 + $0x350] ss:$8 sps:$4 sm:$0xff]  }
 0x12b   :  { %v326_v6 = vpack.c.bf16 %v291_v1, %v291_v1  ;;  %v1295_v1 = vld [vmem:[#allocation2 + $0x364] ss:$8 sps:$4 sm:$0xff]   ;;  %v1293_v2 = vld [vmem:[#allocation2 + $0x360] ss:$8 sps:$4 sm:$0xff]  }
 0x12c   :  { %v327_v4 = vpack.c.bf16 %v292_v3, %v292_v3  ;;  %v1298_v3 = vld [vmem:[#allocation2 + $0x374] ss:$8 sps:$4 sm:$0xff]  }
 0x12e   :  { %456 = vmatprep.mubr.bf16.mxu1 %v327_v4  ;;  %v1296_v4 = vld [vmem:[#allocation2 + $0x370] ss:$8 sps:$4 sm:$0xff]  }
 0x12f   :  { %457 = vmatmul.mubr.bf16.vlgmr.msra.gmra.mrb[0].mxu1 %v326_v6  ;;  %v1304_v6 = vld [vmem:[#allocation2 + $0x394] ss:$8 sps:$4 sm:$0xff]  }
 0x130   :  { %1142 = vmatpush3.bf16.msra.mxu1 %v1267_v5  ;;  %1157 = vmatprep.mubr.msk.bf16.mxu1 %vm1349_vm0, %v1348_v52  ;;  %v1301_v5 = vld [vmem:[#allocation2 + $0x384] ss:$8 sps:$4 sm:$0xff]  }
 0x131   :  { %1143 = vmatprep.subr.bf16.mxu1 %v1348_v52 }
 0x134   :  { %1144 = vmatpush3.bf16.msra.mxu1 %v1268_v7  ;;  %v1302_v7 = vld [vmem:[#allocation2 + $0x390] ss:$8 sps:$4 sm:$0xff]  }
 0x135   :  { %1145 = vmatprep.subr.bf16.mxu1 %v1348_v52 }
 0x138   :  { %1146 = vmatpush3.bf16.msra.mxu1 %v1269_v8  ;;  %v1307_v8 = vld [vmem:[#allocation2 + $0x3a4] ss:$8 sps:$4 sm:$0xff]  }
 0x139   :  { %1147 = vmatprep.subr.bf16.mxu1 %v1348_v52 }
 0x13c   :  { %1148 = vmatpush3.bf16.msra.mxu1 %v1270_v9  ;;  %v1305_v9 = vld [vmem:[#allocation2 + $0x3a0] ss:$8 sps:$4 sm:$0xff]  }
 0x13d   :  { %1149 = vmatprep.subr.bf16.mxu1 %v1348_v52 }
 0x140   :  { %1150 = vmatpush3.bf16.msra.mxu1 %v1271_v10  ;;  %v669_v10 = vld [vmem:[%s1475_s3 + $0x4] ss:$0 sm:$0xff] }
 0x141   :  { %1151 = vmatprep.subr.bf16.mxu1 %v1348_v52 }
 0x144   :  { %1152 = vmatpush3.bf16.msra.mxu1 %v1272_v11 }
 0x145   :  { %1153 = vmatprep.subr.bf16.mxu1 %v1348_v52 }
 0x148   :  { %1154 = vmatpush3.bf16.msra.mxu1 %v1273_v12 }
 0x149   :  { %1155 = vmatprep.subr.bf16.mxu1 %v1348_v52 }
 0x14c   :  { %1156 = vmatpush3.bf16.msra.mxu1 %v1274_v13 }
 0x14d   :  { %1173 = vmatprep.subr.bf16.mxu1 %v1348_v52 }
 0x202   :  { %v1111_v16 = vpop.f32.mrb[0].mxu1 }
 0x203   :  { %v1112_v18 = vpop.f32.mrb[1].mxu1 }
 0x204   :  { %v1113_v19 = vadd.f32 %v1112_v18, %v1111_v16  ;;  %v1114_v20 = vpop.f32.mrb[2].mxu1  ;;  %v1310_v18 = vld [vmem:[#allocation2 + $0x3b4] ss:$8 sps:$4 sm:$0xff]  }
 0x205   :  { %v1115_v21 = vpop.f32.mrb[3].mxu1  ;;  %v1350_v20 = vmov 0  }
 0x206   :  { %v459_v22 = vadd.f32 %v1113_v19, %v325_v17  ;;  %v1308_v19 = vld [vmem:[#allocation2 + $0x3b0] ss:$8 sps:$4 sm:$0xff]   ;;  %v747_v21 = vld [vmem:[%s1475_s3 + $0x5] ss:$0 sm:$0xff] }
 0x208   :  { %v464_v23 = vmax.f32 %v459_v22, 0.0 }
 0x20a   :  { %v482_v24 = vpack.c.bf16 %v464_v23, %v464_v23 }
 0x20c   :  { %1158 = vmatmul.mubr.bf16.vlgmr.msra.gmra.mrb[4].mxu1 %v482_v24 }
 0x20d   :  { %1181 = vmatprep.mubr.msk.bf16.mxu1 %vm1349_vm0, %v1348_v52  ;;  %1174 = vmatpush3.bf16.msra.mxu1 %v1279_v35 }
 0x20e   :  { %1175 = vmatprep.subr.bf16.mxu1 %v1348_v52 }
 0x211   :  { %1176 = vmatpush3.bf16.msra.mxu1 %v1280_v36 }
 0x212   :  { %1177 = vmatprep.subr.bf16.mxu1 %v1348_v52 }
 0x215   :  { %1178 = vmatpush3.bf16.msra.mxu1 %v1281_v37 }
 0x216   :  { %1179 = vmatprep.subr.bf16.mxu1 %v1348_v52 }
 0x219   :  { %1180 = vmatpush3.bf16.msra.mxu1 %v1282_v38 }
 0x21a   :  { %927 = vmatprep.subr.bf16.mxu1 %v1289_v63 }
 0x2df   :  { %v565_v28 = vpop.f32.mrb[4].mxu1 }
 0x2e0   :  { %v566_v29 = vadd.f32 %v565_v28, %v481_v27  ;;  %v1159_v30 = vpop.f32.mrb[5].mxu1 }
 0x2e1   :  { %v568_v31 = vpop.f32.mrb[6].mxu1 }
 0x2e2   :  { %v571_v32 = vmax.f32 %v566_v29, 0.0  ;;  %v1160_v33 = vpop.f32.mrb[7].mxu1  ;;  %v1077_v29 = vld [vmem:[%s1475_s3 + $0x6] ss:$8 sm:$0x3] }
 0x2e3   :  { %v840_v30 = vrot.slane %v1077_v29, %v82_v55  ;;  %v844_v31 = vrot.slane %v1077_v29, %v86_v57 }
 0x2e4   :  { %v581_v34 = vpack.c.bf16 %v571_v32, %v571_v32 }
 0x2e6   :  { %1170 = vmatmul.mubr.msk.bf16.vlgmr.msra.gmra.mrb[4].mxu0 %vm606_vm1, %v581_v34 }
 0x2e7   :  { %1193 = vmatprep.mubr.msk.bf16.mxu0 %vm1349_vm0, %v1348_v52  ;;  %1186 = vmatpush3.bf16.msra.mxu0 %v1283_v39 }
 0x2e8   :  { %1187 = vmatprep.subr.bf16.mxu0 %v1348_v52 }
 0x2eb   :  { %1188 = vmatpush3.bf16.msra.mxu0 %v1284_v40 }
 0x2ec   :  { %1189 = vmatprep.subr.bf16.mxu0 %v1348_v52 }
 0x2ef   :  { %1190 = vmatpush3.bf16.msra.mxu0 %v1285_v60 }
 0x2f0   :  { %1191 = vmatprep.subr.bf16.mxu0 %v1348_v52  ;;  %v1299_v52 = vld [vmem:[#allocation2 + $0x380] ss:$8 sps:$4 sm:$0xff]  }
 0x2f3   :  { %1192 = vmatpush3.bf16.msra.mxu0 %v1286_v61 }
 0x3b9   :  { %v644_v42 = vpop.f32.mrb[4].mxu0 }
 0x3ba   :  { %v645_v43 = vadd.f32 %v644_v42, %v580_v41  ;;  %v1171_v44 = vpop.f32.mrb[5].mxu0 }
 0x3bb   :  { %v647_v45 = vpop.f32.mrb[6].mxu0 }
 0x3bc   :  { %v654_v46 = vmul.f32 0.5, %v645_v43  ;;  %999 = vst.msk [vmem:[%s1476_s4 + $0x4] sm:$0x3] %vm998_vm2, %v645_v43  ;;  %v1172_v47 = vpop.f32.mrb[7].mxu0 }
 0x3be   :  { %v655_v48 = vmul.f32 1.442695, %v654_v46 }
 0x3c0   :  { %1311 = vpow2.f32 %v655_v48 }
 0x3ca   :  { %v1312_v51 = vpop.eup %1311 }
 0x3cb   :  { %v657_v56 = vmul.f32 %v1312_v51, %v653_v50 }
 0x3cd   :  { %v660_v58 = vsel %vm652_vm3, %v645_v43, %v657_v56 }
 0x3ce   :  { %v670_v59 = vpack.c.bf16 %v660_v58, %v660_v58 }
 0x3d0   :  { %1182 = vmatmul.mubr.msk.bf16.vlgmr.msra.gmra.mrb[8].mxu1 %vm606_vm1, %v670_v59 }
 0x3d1   :  { %928 = vmatpush1.bf16.msra.mxu1 %v1287_v62  ;;  %959 = vmatprep.mubr.bf16.mxu1 %v1350_v20 }
 0x3d2   :  { %929 = vmatprep.subr.bf16.mxu1 %v1292_v53 }
 0x3d5   :  { %930 = vmatpush1.bf16.msra.mxu1 %v1290_v0 }
 0x3d6   :  { %931 = vmatprep.subr.bf16.mxu1 %v1295_v1 }
 0x3d9   :  { %932 = vmatpush1.bf16.msra.mxu1 %v1293_v2 }
 0x3da   :  { %933 = vmatprep.subr.bf16.mxu1 %v1298_v3 }
 0x3dd   :  { %934 = vmatpush1.bf16.msra.mxu1 %v1296_v4 }
 0x3de   :  { %935 = vmatprep.subr.bf16.mxu1 %v1301_v5 }
 0x3e1   :  { %936 = vmatpush1.bf16.msra.mxu1 %v1299_v52 }
 0x3e2   :  { %937 = vmatprep.subr.bf16.mxu1 %v1304_v6 }
 0x3e5   :  { %938 = vmatpush1.bf16.msra.mxu1 %v1302_v7 }
 0x3e6   :  { %939 = vmatprep.subr.bf16.mxu1 %v1307_v8 }
 0x3e9   :  { %940 = vmatpush1.bf16.msra.mxu1 %v1305_v9 }
 0x3ea   :  { %941 = vmatprep.subr.bf16.mxu1 %v1310_v18 }
 0x3ed   :  { %942 = vmatpush1.bf16.msra.mxu1 %v1308_v19 }
 0x4a3   :  { %v732_v11 = vpop.f32.mrb[8].mxu1 }
 0x4a4   :  { %v733_v12 = vadd.f32 %v732_v11, %v669_v10  ;;  %v1183_v13 = vpop.f32.mrb[9].mxu1 }
 0x4a5   :  { %v735_v14 = vpop.f32.mrb[10].mxu1 }
 0x4a6   :  { %v738_v15 = vmax.f32 %v733_v12, 0.0  ;;  %v1184_v16 = vpop.f32.mrb[11].mxu1 }
 0x4a8   :  { %v748_v17 = vpack.c.bf16 %v738_v15, %v738_v15 }
 0x4aa   :  { %1194 = vmatmul.mubr.msk.bf16.vlgmr.msra.gmra.mrb[8].mxu0 %vm606_vm1, %v748_v17 }
 0x57d   :  { %v810_v22 = vpop.f32.mrb[8].mxu0 }
 0x57e   :  { %v811_v23 = vadd.f32 %v810_v22, %v747_v21  ;;  %v1195_v24 = vpop.f32.mrb[9].mxu0 }
 0x57f   :  { %v813_v25 = vpop.f32.mrb[10].mxu0 }
 0x580   :  { %v816_v26 = vmax.f32 %v811_v23, 0.0  ;;  %v1196_v27 = vpop.f32.mrb[11].mxu0 }
 0x582   :  { %v835_v28 = vpack.c.bf16 %v816_v26, %v816_v26 }
 0x584   :  { %960 = vmatmul.mubr.bf16.vlgmr.msra.gmra.mrb[12].mxu1 %v835_v28 }
 0x657   :  { %v961_v32 = vpop.f32.mrb[12].mxu1 }
 0x658   :  { %v962_v33 = vadd.f32 %v961_v32, %v840_v30  ;;  %v963_v34 = vpop.f32.mrb[13].mxu1 }
 0x659   :  { %v964_v35 = vadd.f32 %v963_v34, %v844_v31  ;;  %v965_v36 = vpop.f32.mrb[14].mxu1 }
 0x65a   :  { %v968_v37 = vand.u32 2147483647, %v962_v33  ;;  %v966_v38 = vpop.f32.mrb[15].mxu1  ;;  %vm980_vm4 = vcmp.ge.f32.partialorder %v962_v33, 0.0 }
 0x65b   :  { %v969_v39 = vand.u32 2147483647, %v964_v35  ;;  %vm981_vm5 = vcmp.ge.f32.partialorder %v964_v35, 0.0 }
 0x65c   :  { %v970_v40 = vsub.f32 0.0, %v968_v37 }
 0x65d   :  { %v971_v41 = vsub.f32 0.0, %v969_v39 }
 0x65e   :  { %v972_v42 = vmul.f32 1.442695, %v970_v40 }
 0x65f   :  { %v974_v43 = vmul.f32 1.442695, %v971_v41 }
 0x660   :  { %1313 = vpow2.f32 %v972_v42 }
 0x661   :  { %1315 = vpow2.f32 %v974_v43 }
 0x66a   :  { %v1314_v44 = vpop.eup %1313 }
 0x66b   :  { %v1316_v45 = vpop.eup %1315  ;;  %v976_v55 = vadd.f32 1.0, %v1314_v44 }
 0x66c   :  { %v977_v46 = vadd.f32 1.0, %v1316_v45 }
 0x66d   :  { %1317 = vrcp.f32 %v976_v55 }
 0x66e   :  { %1319 = vrcp.f32 %v977_v46 }
 0x677   :  { %v1318_v54 = vpop.eup %1317 }
 0x678   :  { %v1320_v57 = vpop.eup %1319  ;;  %v982_v47 = vmul.f32 %v1318_v54, %v1314_v44 }
 0x679   :  { %v983_v48 = vmul.f32 %v1320_v57, %v1316_v45 }
 0x67a   :  { %v984_v49 = vsel %vm980_vm4, %v1318_v54, %v982_v47 }
 0x67b   :  { %v985_v50 = vsel %vm981_vm5, %v1320_v57, %v983_v48 }
 0x67c   :  { %v988_v51 = vcombine.low %v984_v49, %v985_v50 }
 0x67e   :  { %1094 = vst.sshfl [vmem:[%s1476_s4] sm:$0x33 pattern:$0x76325410] %v988_v51 }
 0x67f   :  { %1004 = vsyncpa [#allocation3], 1 }

</bundles_post_ra>
